<compile_context>
chip_gen: v5e
topology: v5e:2x2
jax: 0.10.0
libtpu: 0.0.40
codegen_flags: <defaults>
</compile_context>

<pallas_src>
import jax
import jax.numpy as jnp
from jax.experimental import pallas as pl
from jax.experimental.pallas import tpu as pltpu


def _round_up(n, m):
    return ((n + m - 1) // m) * m


def _cdiv(a, b):
    return -(-a // b)


def classifier_kernel(x_ref, w1_ref, b1_ref, w2_ref, b2_ref, o_ref):
    # x.float(): all math in f32; MXU accumulates in f32.
    x = x_ref[...].astype(jnp.float32)

    # Hidden layer: x @ W1^T + b1, then ReLU (weights are pre-transposed/padded).
    h = jnp.dot(x, w1_ref[...], preferred_element_type=jnp.float32) + b1_ref[...]
    h = jnp.maximum(h, 0.0)

    # Output layer: h @ W2^T + b2 (padded cols are exact zeros, sliced off in the wrapper).
    o_ref[...] = jnp.dot(h, w2_ref[...], preferred_element_type=jnp.float32) + b2_ref[...]


def classifier_forward(x, packed_params, *, output_size, batch_tile=2048):
    """x: [B, input_size] in its native float dtype (cast to f32 inside the kernel,
       matching the PyTorch module's `x.float()`).
       packed_params: (w1_t [in, H_pad], b1 [1, H_pad], w2_t [H_pad, O_pad], b2 [1, O_pad])."""
    w1_t, b1, w2_t, b2 = packed_params
    B, input_size = x.shape
    H_pad = w1_t.shape[1]
    O_pad = w2_t.shape[1]

    # Batch tile:
    #  - large (default 2048) to amortize per-grid-step pipeline overhead,
    #  - never larger than ~B/2 (rounded up to 8) so the grid has >= 2 steps whenever
    #    B > 8, letting the "parallel" axis shard across v7x's two TensorCores,
    #  - always a multiple of 8 (sublane alignment of the BlockSpec).
    TB = min(batch_tile, _round_up(max(_cdiv(B, 2), 1), 8))
    TB = max(8, _round_up(TB, 8))
    grid = _cdiv(B, TB)  # ragged last block: output write is masked by Pallas, no jnp.pad copy

    # Scoped-VMEM estimate (double-buffered x/out tiles + weights). Only raise the limit
    # when a huge batch_tile would exceed the v5e 16 MiB default; cap well under v7x's
    # 64 MiB physical VMEM.
    tile_bytes = 4 * TB * (input_size + O_pad)
    weight_bytes = 4 * (input_size * H_pad + H_pad + H_pad * O_pad + O_pad)
    vmem_est = 2 * tile_bytes + 2 * weight_bytes
    vmem_limit = None
    if vmem_est > 12 * 1024 * 1024:
        vmem_limit = min(vmem_est + (4 << 20), 48 << 20)

    out = pl.pallas_call(
        classifier_kernel,
        out_shape=jax.ShapeDtypeStruct((B, O_pad), jnp.float32),
        grid=(grid,),
        in_specs=[
            pl.BlockSpec((TB, input_size), lambda i: (i, 0)),      # x: tiled over batch
            pl.BlockSpec((input_size, H_pad), lambda i: (0, 0)),   # W1^T: VMEM-resident
            pl.BlockSpec((1, H_pad), lambda i: (0, 0)),            # b1
            pl.BlockSpec((H_pad, O_pad), lambda i: (0, 0)),        # W2^T: VMEM-resident
            pl.BlockSpec((1, O_pad), lambda i: (0, 0)),            # b2
        ],
        out_specs=pl.BlockSpec((TB, O_pad), lambda i: (i, 0)),
        compiler_params=pltpu.CompilerParams(
            dimension_semantics=("parallel",),   # shard batch tiles across TCs on v7x
            vmem_limit_bytes=vmem_limit,
        ),
    )(x, w1_t, b1, w2_t, b2)

    # Strip the lane padding of the output dim (padded cols are exact zeros).
    return out[:, :output_size]


def init_raw_params(key, input_size, L_node=315, output_size=19):
    """nn.Linear-shaped params:
       L_W1.weight: [L_node, input_size], L_W1.bias: [L_node]
       L_W2.weight: [output_size, L_node], L_W2.bias: [output_size]."""
    k1, k2, k3, k4 = jax.random.split(key, 4)
    bound1 = 1.0 / jnp.sqrt(input_size)
    bound2 = 1.0 / jnp.sqrt(L_node)
    w1 = jax.random.uniform(k1, (L_node, input_size), jnp.float32, -bound1, bound1)
    b1 = jax.random.uniform(k2, (L_node,), jnp.float32, -bound1, bound1)
    w2 = jax.random.uniform(k3, (output_size, L_node), jnp.float32, -bound2, bound2)
    b2 = jax.random.uniform(k4, (output_size,), jnp.float32, -bound2, bound2)
    return w1, b1, w2, b2


def pack_params(w1, b1, w2, b2):
    """Pre-transpose to [in, out] and zero-pad the hidden/output lane dims to
       multiples of 128 so all matmuls and the output store are lane-dense."""
    L_node, input_size = w1.shape
    output_size = w2.shape[0]
    H_pad = _round_up(L_node, 128)                 # 315 -> 384
    O_pad = _round_up(output_size, 128)            # 19  -> 128

    w1_t = jnp.zeros((input_size, H_pad), jnp.float32).at[:, :L_node].set(w1.T)
    b1_p = jnp.zeros((1, H_pad), jnp.float32).at[:, :L_node].set(b1[None, :])
    w2_t = jnp.zeros((H_pad, O_pad), jnp.float32).at[:L_node, :output_size].set(w2.T)
    b2_p = jnp.zeros((1, O_pad), jnp.float32).at[:, :output_size].set(b2[None, :])
    return w1_t, b1_p, w2_t, b2_p


if __name__ == "__main__":
    key = jax.random.PRNGKey(0)
    k_x, k_p, k_x2, k_x3 = jax.random.split(key, 4)

    batch = 8
    input_size = 32
    L_node = 315
    output_size = 19

    w1, b1, w2, b2 = init_raw_params(k_p, input_size, L_node, output_size)
    packed = pack_params(w1, b1, w2, b2)

    def ref_forward(x):
        xf = x.astype(jnp.float32)
        return jnp.maximum(xf @ w1.T + b1[None, :], 0.0) @ w2.T + b2[None, :]

    # 1) Small single-tile case.
    x = jax.random.normal(k_x, (batch, input_size), jnp.float32)
    out = classifier_forward(x, packed, output_size=output_size)
    out = jax.block_until_ready(out)
    assert out.shape == (batch, output_size)
    assert jnp.allclose(out, ref_forward(x), atol=1e-4, rtol=1e-4)

    # 2) Multi-tile case (exercises the batch grid path; batch divides the tile evenly).
    x2 = jax.random.normal(k_x2, (48, input_size), jnp.float32)
    out2 = classifier_forward(x2, packed, output_size=output_size, batch_tile=16)
    out2 = jax.block_until_ready(out2)
    assert out2.shape == (48, output_size)
    assert jnp.allclose(out2, ref_forward(x2), atol=1e-4, rtol=1e-4)

    # 3) Ragged multi-tile case + non-multiple-of-8 batch_tile (exercises the masked last
    #    block and the TB round-up robustness fix).
    x3 = jax.random.normal(k_x3, (50, input_size), jnp.float32)
    out3 = classifier_forward(x3, packed, output_size=output_size, batch_tile=20)
    out3 = jax.block_until_ready(out3)
    assert out3.shape == (50, output_size)
    assert jnp.allclose(out3, ref_forward(x3), atol=1e-4, rtol=1e-4)

    print("KERNEL_OK")
</pallas_src>

<mosaic_0001>
module attributes {stable_mosaic.version = 11 : i64} {
  func.func @classifier_kernel(%arg0: i32, %arg1: memref<8x32xf32, #tpu.memory_space<vmem>>, %arg2: memref<32x384xf32, #tpu.memory_space<vmem>>, %arg3: memref<1x384xf32, #tpu.memory_space<vmem>>, %arg4: memref<384x128xf32, #tpu.memory_space<vmem>>, %arg5: memref<1x128xf32, #tpu.memory_space<vmem>>, %arg6: memref<8x128xf32, #tpu.memory_space<vmem>>) attributes {dimension_semantics = [#tpu.dimension_semantics<parallel>], iteration_bounds = array<i64: 1>, scalar_prefetch = 0 : i64, scratch_operands = 0 : i64, tpu.core_type = #tpu.core_type<tc>, window_params = [{transform_indices = @transform_0, window_bounds = array<i64: 8, 32>}, {pipeline_mode = #tpu.pipeline_mode<synchronous>, transform_indices = @transform_1, window_bounds = array<i64: 32, 384>}, {pipeline_mode = #tpu.pipeline_mode<synchronous>, transform_indices = @transform_2, window_bounds = array<i64: 1, 384>}, {pipeline_mode = #tpu.pipeline_mode<synchronous>, transform_indices = @transform_3, window_bounds = array<i64: 384, 128>}, {pipeline_mode = #tpu.pipeline_mode<synchronous>, transform_indices = @transform_4, window_bounds = array<i64: 1, 128>}, {transform_indices = @transform_5, window_bounds = array<i64: 8, 128>}]} {
    %c0 = arith.constant 0 : index
    %c0_0 = arith.constant 0 : index
    %0 = vector.load %arg1[%c0, %c0_0] : memref<8x32xf32, #tpu.memory_space<vmem>>, vector<8x32xf32>
    %c0_1 = arith.constant 0 : index
    %c0_2 = arith.constant 0 : index
    %1 = vector.load %arg2[%c0_1, %c0_2] : memref<32x384xf32, #tpu.memory_space<vmem>>, vector<32x384xf32>
    %cst = arith.constant dense<0.000000e+00> : vector<8x384xf32>
    %2 = tpu.matmul %0, %1, %cst {dimension_numbers = #tpu.dot_dimension_numbers<[1], [0], [0], [1], [0, 0, 1, 1], [], []>} : vector<8x32xf32>, vector<32x384xf32>, vector<8x384xf32> -> vector<8x384xf32>
    %c0_3 = arith.constant 0 : index
    %c0_4 = arith.constant 0 : index
    %3 = vector.load %arg3[%c0_3, %c0_4] : memref<1x384xf32, #tpu.memory_space<vmem>>, vector<1x384xf32>
    %4 = vector.broadcast %3 : vector<1x384xf32> to vector<8x384xf32>
    %5 = arith.addf %2, %4 : vector<8x384xf32>
    %cst_5 = arith.constant 0.000000e+00 : f32
    %6 = vector.broadcast %cst_5 : f32 to vector<8x384xf32>
    %7 = arith.maximumf %5, %6 : vector<8x384xf32>
    %c0_6 = arith.constant 0 : index
    %c0_7 = arith.constant 0 : index
    %8 = vector.load %arg4[%c0_6, %c0_7] : memref<384x128xf32, #tpu.memory_space<vmem>>, vector<384x128xf32>
    %cst_8 = arith.constant dense<0.000000e+00> : vector<8x128xf32>
    %9 = tpu.matmul %7, %8, %cst_8 {dimension_numbers = #tpu.dot_dimension_numbers<[1], [0], [0], [1], [0, 0, 1, 1], [], []>} : vector<8x384xf32>, vector<384x128xf32>, vector<8x128xf32> -> vector<8x128xf32>
    %c0_9 = arith.constant 0 : index
    %c0_10 = arith.constant 0 : index
    %10 = vector.load %arg5[%c0_9, %c0_10] : memref<1x128xf32, #tpu.memory_space<vmem>>, vector<1x128xf32>
    %11 = vector.broadcast %10 : vector<1x128xf32> to vector<8x128xf32>
    %12 = arith.addf %9, %11 : vector<8x128xf32>
    %c0_11 = arith.constant 0 : index
    %c0_12 = arith.constant 0 : index
    %13 = vector.load %arg6[%c0_11, %c0_12] : memref<8x128xf32, #tpu.memory_space<vmem>>, vector<8x128xf32>
    tpu.vector_store %arg6[%c0_11, %c0_12], %12 {strides = array<i32>} : memref<8x128xf32, #tpu.memory_space<vmem>>, vector<8x128xf32>,
    return
  }
  func.func @transform_0(%arg0: i32) -> (i32, i32) {
    %c0_i32 = arith.constant 0 : i32
    %c0_i32_0 = arith.constant 0 : i32
    return %arg0, %c0_i32 : i32, i32
  }
  func.func @transform_1(%arg0: i32) -> (i32, i32) {
    %c0_i32 = arith.constant 0 : i32
    %c0_i32_0 = arith.constant 0 : i32
    %c0_i32_1 = arith.constant 0 : i32
    return %c0_i32, %c0_i32_0 : i32, i32
  }
  func.func @transform_2(%arg0: i32) -> (i32, i32) {
    %c0_i32 = arith.constant 0 : i32
    %c0_i32_0 = arith.constant 0 : i32
    %c0_i32_1 = arith.constant 0 : i32
    return %c0_i32, %c0_i32_0 : i32, i32
  }
  func.func @transform_3(%arg0: i32) -> (i32, i32) {
    %c0_i32 = arith.constant 0 : i32
    %c0_i32_0 = arith.constant 0 : i32
    %c0_i32_1 = arith.constant 0 : i32
    return %c0_i32, %c0_i32_0 : i32, i32
  }
  func.func @transform_4(%arg0: i32) -> (i32, i32) {
    %c0_i32 = arith.constant 0 : i32
    %c0_i32_0 = arith.constant 0 : i32
    %c0_i32_1 = arith.constant 0 : i32
    return %c0_i32, %c0_i32_0 : i32, i32
  }
  func.func @transform_5(%arg0: i32) -> (i32, i32) {
    %c0_i32 = arith.constant 0 : i32
    %c0_i32_0 = arith.constant 0 : i32
    return %arg0, %c0_i32 : i32, i32
  }
}

</mosaic_0001>

<bundles_post_ra>
// kernel: tpu_custom_call.1
= control target key start
LH: loop header
LB: loop body
LE: loop exit
PB: predicated region body
PF: predicated region fallthrough
CT: control target
= control target key end

     0   :  { %10 = vsyncpa [#allocation3], 0  ;;  %s506_s0 = inlined_call_operand.hbm [shape: f32[8,32], index: 0, kind: input, shape index: {}]   ;;  %s507_s1 = inlined_call_operand.hbm [shape: f32[32,384], index: 1, kind: input, shape index: {}]   ;;  %s508_s2 = inlined_call_operand.hbm [shape: f32[1,384], index: 2, kind: input, shape index: {}]   ;;  %s509_s3 = inlined_call_operand.hbm [shape: f32[384,128], index: 3, kind: input, shape index: {}]   ;;  %s510_s4 = inlined_call_operand.vmem [shape: f32[1,128], index: 4, kind: input, shape index: {}]   ;;  %s511_s5 = inlined_call_operand.hbm [shape: f32[8,128], index: 5, kind: output, shape index: {}]  }
   0x1   :  { %11 = vsyncpa [#allocation6], 0 }
   0x2   :  { %12 = vsyncpa [#allocation9], 0  ;;  %s29_s20 = sshll.u32 %s507_s1, 4  ;;  %s30_s20 = int_to_ptr.hbm [resolvable:$true] %s29_s20 }
   0x3   :  { %13 = vsyncpa [#allocation4], 0  ;;  %s441_s21 = smov [#allocation5]   ;;  %s19_s25 = sshll.u32 %s506_s0, 4  ;;  %s20_s25 = int_to_ptr.hbm [resolvable:$true] %s19_s25 }
   0x4   :  { %s31_s22 = sshll.u32 %s441_s21, 4  ;;  %s442_s26 = smov 384   ;;  %s32_s22 = int_to_ptr.vmem [resolvable:$true] %s31_s22 }
   0x5   :  { %s443_s27 = smov 24   ;;  %s444_s28 = smov [#allocation2]  }
   0x6   :  { %37 = dma.hbm_to_vmem [thread:$0]  %s30_s20, 1536, %s32_s22, [#allocation6], %s442_s26, %s442_s26, %s443_s27  }
   0x7   :  { %s21_s29 = sshll.u32 %s444_s28, 4  ;;  %s43_s7 = sshll.u32 %s508_s2, 4  ;;  %s22_s29 = int_to_ptr.vmem [resolvable:$true] %s21_s29  ;;  %s44_s7 = int_to_ptr.hbm [resolvable:$true] %s43_s7 }
   0x8   :  { %24 = dma.hbm_to_vmem [thread:$0]  %s20_s25, 128, %s22_s29, [#allocation3]  }
   0x9   :  { %s53_s9 = sshll.u32 %s509_s3, 4  ;;  %s445_s10 = smov [#allocation7]   ;;  %s54_s9 = int_to_ptr.hbm [resolvable:$true] %s53_s9 }
   0xa   :  { %s45_s11 = sshll.u32 %s445_s10, 4  ;;  %s446_s0 = smov [#allocation8]   ;;  %s46_s11 = int_to_ptr.vmem [resolvable:$true] %s45_s11 }
   0xb   :  { %48 = dma.hbm_to_vmem [thread:$0]  %s44_s7, 48, %s46_s11, [#allocation6]  }
   0xc   :  { %s55_s12 = sshll.u32 %s446_s0, 4  ;;  %s447_s13 = smov 128   ;;  %s56_s12 = int_to_ptr.vmem [resolvable:$true] %s55_s12 }
   0xd   :  { %s448_s14 = smov 8  }
   0xe   :  { %61 = dma.hbm_to_vmem [thread:$0]  %s54_s9, 6144, %s56_s12, [#allocation9], %s447_s13, %s447_s13, %s448_s14  }
   0xf   :  { %433 = dma.done.wait [#allocation3], 128  }
  0x10   :  { %434 = vsyncadd [#allocation3], 4294967168 }
  0x11   :  { %435 = dma.done.wait [#allocation6], 1584  }
  0x12   :  { %436 = vsyncadd [#allocation6], 4294965712 }
  0x13   :  { %437 = dma.done.wait [#allocation9], 6144  }
  0x14   :  { %438 = vsyncadd [#allocation9], 4294961152  ;;  %v90_v0 = vld [vmem:[#allocation5 + $0x48] sm:$0xff]  ;;  %v87_v1 = vld [vmem:[#allocation5 + $0x30] sm:$0xff]  ;;  %vm101_vm0 = vcmask 261120   ;;  %s449_s15 = smov [#allocation10]  }
  0x15   :  { %117 = vmatpush.msra.mxu2 %v90_v0  ;;  %v84_v2 = vld [vmem:[#allocation5 + $0x18] sm:$0xff]  ;;  %v81_v3 = vld [vmem:[#allocation5] sm:$0xff]  ;;  %v91_v7 = vld [vmem:[#allocation5 + $0x50] sm:$0xff]  ;;  %s286_s16 = sshll.u32 %s449_s15, 4  ;;  %s288_s19 = sshll.u32 %s511_s5, 4  ;;  %s287_s16 = int_to_ptr.vmem [resolvable:$true] %s286_s16  ;;  %s289_s19 = int_to_ptr.hbm [resolvable:$true] %s288_s19 }
  0x16   :  { %v183_v4 = vld [vmem:[#allocation8 + $0x78] sm:$0xff]  ;;  %v182_v5 = vld [vmem:[#allocation8 + $0x70] sm:$0xff]  ;;  %v181_v8 = vld [vmem:[#allocation8 + $0x68] sm:$0xff] }
  0x17   :  { %118 = vmatpush.msra.mxu2 %v87_v1  ;;  %v492_v6 = vld [vmem:[#allocation2] sm:$0xff]  ;;  %220 = vmatpush.msra.mxu3 %v183_v4  ;;  %v180_v12 = vld [vmem:[#allocation8 + $0x60] sm:$0xff]  ;;  %v197_v13 = vld [vmem:[#allocation8 + $0xe8] sm:$0xff] }
  0x18   :  { %v199_v9 = vld [vmem:[#allocation8 + $0xf8] sm:$0xff]  ;;  %v198_v10 = vld [vmem:[#allocation8 + $0xf0] sm:$0xff]  ;;  %v196_v18 = vld [vmem:[#allocation8 + $0xe0] sm:$0xff] }
  0x19   :  { %119 = vmatpush.msra.mxu2 %v84_v2  ;;  %221 = vmatpush.msra.mxu3 %v182_v5  ;;  %v88_v11 = vld [vmem:[#allocation5 + $0x38] sm:$0xff]  ;;  %v85_v15 = vld [vmem:[#allocation5 + $0x20] sm:$0xff]  ;;  %v213_v19 = vld [vmem:[#allocation8 + $0x168] sm:$0xff] }
  0x1a   :  { %240 = vmatpush.msra.mxu0 %v199_v9  ;;  %v215_v14 = vld [vmem:[#allocation8 + $0x178] sm:$0xff]  ;;  %v214_v17 = vld [vmem:[#allocation8 + $0x170] sm:$0xff]  ;;  %v82_v20 = vld [vmem:[#allocation5 + $0x8] sm:$0xff] }
  0x1b   :  { %120 = vmatpush.msra.mxu2 %v81_v3  ;;  %222 = vmatpush.msra.mxu3 %v181_v8  ;;  %v179_v16 = vld [vmem:[#allocation8 + $0x58] sm:$0xff]  ;;  %v178_v21 = vld [vmem:[#allocation8 + $0x50] sm:$0xff]  ;;  %v177_v24 = vld [vmem:[#allocation8 + $0x48] sm:$0xff] }
  0x1c   :  { %300 = vmatmul.msk.f32.vlgmr.msra.gmra.mxu2 %vm101_vm0, %v492_v6  ;;  %241 = vmatpush.msra.mxu0 %v198_v10  ;;  %v195_v22 = vld [vmem:[#allocation8 + $0xd8] sm:$0xff]  ;;  %v194_v25 = vld [vmem:[#allocation8 + $0xd0] sm:$0xff]  ;;  %v212_v26 = vld [vmem:[#allocation8 + $0x160] sm:$0xff] }
  0x1d   :  { %137 = vmatpush.msrb.mxu2 %v91_v7  ;;  %260 = vmatpush.msra.mxu1 %v215_v14  ;;  %v92_v23 = vld [vmem:[#allocation5 + $0x58] sm:$0xff]  ;;  %v89_v27 = vld [vmem:[#allocation5 + $0x40] sm:$0xff]  ;;  %v193_v29 = vld [vmem:[#allocation8 + $0xc8] sm:$0xff] }
  0x1e   :  { %223 = vmatpush.msra.mxu3 %v180_v12  ;;  %242 = vmatpush.msra.mxu0 %v197_v13  ;;  %v176_v28 = vld [vmem:[#allocation8 + $0x40] sm:$0xff]  ;;  %v211_v30 = vld [vmem:[#allocation8 + $0x158] sm:$0xff]  ;;  %v83_v34 = vld [vmem:[#allocation5 + $0x10] sm:$0xff] }
  0x1f   :  { %138 = vmatpush.msrb.mxu2 %v88_v11  ;;  %261 = vmatpush.msra.mxu1 %v214_v17  ;;  %v86_v31 = vld [vmem:[#allocation5 + $0x28] sm:$0xff]  ;;  %v175_v32 = vld [vmem:[#allocation8 + $0x38] sm:$0xff]  ;;  %v174_v35 = vld [vmem:[#allocation8 + $0x30] sm:$0xff] }
  0x20   :  { %224 = vmatpush.msra.mxu3 %v179_v16  ;;  %243 = vmatpush.msra.mxu0 %v196_v18  ;;  %v192_v33 = vld [vmem:[#allocation8 + $0xc0] sm:$0xff]  ;;  %v191_v36 = vld [vmem:[#allocation8 + $0xb8] sm:$0xff]  ;;  %v173_v37 = vld [vmem:[#allocation8 + $0x28] sm:$0xff] }
  0x21   :  { %139 = vmatpush.msrb.mxu2 %v85_v15  ;;  %262 = vmatpush.msra.mxu1 %v213_v19  ;;  %v172_v38 = vld [vmem:[#allocation8 + $0x20] sm:$0xff]  ;;  %v171_v39 = vld [vmem:[#allocation8 + $0x18] sm:$0xff]  ;;  %v170_v40 = vld [vmem:[#allocation8 + $0x10] sm:$0xff] }
  0x22   :  { %225 = vmatpush.msra.mxu3 %v178_v21  ;;  %244 = vmatpush.msra.mxu0 %v195_v22  ;;  %v190_v41 = vld [vmem:[#allocation8 + $0xb0] sm:$0xff]  ;;  %v169_v43 = vld [vmem:[#allocation8 + $0x8] sm:$0xff]  ;;  %v168_v46 = vld [vmem:[#allocation8] sm:$0xff] }
  0x23   :  { %140 = vmatpush.msrb.mxu2 %v82_v20  ;;  %263 = vmatpush.msra.mxu1 %v212_v26  ;;  %v210_v42 = vld [vmem:[#allocation8 + $0x150] sm:$0xff]  ;;  %v189_v44 = vld [vmem:[#allocation8 + $0xa8] sm:$0xff]  ;;  %v188_v47 = vld [vmem:[#allocation8 + $0xa0] sm:$0xff] }
  0x24   :  { %301 = vmatmul.msk.f32.vlgmr.msrb.gmra.mxu2 %vm101_vm0, %v492_v6  ;;  %226 = vmatpush.msra.mxu3 %v177_v24  ;;  %v209_v45 = vld [vmem:[#allocation8 + $0x148] sm:$0xff]  ;;  %v208_v48 = vld [vmem:[#allocation8 + $0x140] sm:$0xff]  ;;  %v187_v49 = vld [vmem:[#allocation8 + $0x98] sm:$0xff] }
  0x25   :  { %157 = vmatpush.msra.mxu2 %v92_v23  ;;  %245 = vmatpush.msra.mxu0 %v194_v25  ;;  %v207_v50 = vld [vmem:[#allocation8 + $0x138] sm:$0xff]  ;;  %v186_v51 = vld [vmem:[#allocation8 + $0x90] sm:$0xff]  ;;  %v185_v53 = vld [vmem:[#allocation8 + $0x88] sm:$0xff] }
  0x26   :  { %227 = vmatpush.msra.mxu3 %v176_v28  ;;  %264 = vmatpush.msra.mxu1 %v211_v30  ;;  %v206_v52 = vld [vmem:[#allocation8 + $0x130] sm:$0xff]  ;;  %v205_v54 = vld [vmem:[#allocation8 + $0x128] sm:$0xff]  ;;  %v184_v55 = vld [vmem:[#allocation8 + $0x80] sm:$0xff] }
  0x27   :  { %158 = vmatpush.msra.mxu2 %v89_v27  ;;  %246 = vmatpush.msra.mxu0 %v193_v29  ;;  %v204_v56 = vld [vmem:[#allocation8 + $0x120] sm:$0xff]  ;;  %v203_v57 = vld [vmem:[#allocation8 + $0x118] sm:$0xff]  ;;  %v202_v58 = vld [vmem:[#allocation8 + $0x110] sm:$0xff] }
  0x28   :  { %228 = vmatpush.msra.mxu3 %v175_v32  ;;  %265 = vmatpush.msra.mxu1 %v210_v42  ;;  %v201_v59 = vld [vmem:[#allocation8 + $0x108] sm:$0xff]  ;;  %v200_v60 = vld [vmem:[#allocation8 + $0x100] sm:$0xff]  ;;  %v93_v61 = vld [vmem:[#allocation7] sm:$0x7] }
  0x29   :  { %159 = vmatpush.msra.mxu2 %v86_v31  ;;  %247 = vmatpush.msra.mxu0 %v192_v33  ;;  %v95_v62 = vperm.slane %v93_v61, 0  ;;  %v96_v2 = vperm.slane %v93_v61, 1  ;;  %v312_v10 = vld [vmem:[%s510_s4] ss:$0 sm:$0xff] }
  0x2a   :  { %229 = vmatpush.msra.mxu3 %v174_v35  ;;  %266 = vmatpush.msra.mxu1 %v209_v45 }
  0x2b   :  { %160 = vmatpush.msra.mxu2 %v83_v34  ;;  %248 = vmatpush.msra.mxu0 %v191_v36 }
  0x2c   :  { %302 = vmatmul.msk.f32.vlgmr.msra.gmra.mxu2 %vm101_vm0, %v492_v6  ;;  %230 = vmatpush.msra.mxu3 %v173_v37  ;;  %v97_v6 = vperm.slane %v93_v61, 2 }
  0x2d   :  { %249 = vmatpush.msra.mxu0 %v190_v41  ;;  %267 = vmatpush.msra.mxu1 %v208_v48 }
  0x2e   :  { %231 = vmatpush.msra.mxu3 %v172_v38 }
  0x2f   :  { %250 = vmatpush.msra.mxu0 %v189_v44  ;;  %268 = vmatpush.msra.mxu1 %v207_v50 }
  0x30   :  { %232 = vmatpush.msra.mxu3 %v171_v39 }
  0x31   :  { %251 = vmatpush.msra.mxu0 %v188_v47  ;;  %269 = vmatpush.msra.mxu1 %v206_v52 }
  0x32   :  { %233 = vmatpush.msra.mxu3 %v170_v40 }
  0x33   :  { %252 = vmatpush.msra.mxu0 %v187_v49  ;;  %270 = vmatpush.msra.mxu1 %v205_v54 }
  0x34   :  { %234 = vmatpush.msra.mxu3 %v169_v43 }
  0x35   :  { %253 = vmatpush.msra.mxu0 %v186_v51  ;;  %271 = vmatpush.msra.mxu1 %v204_v56 }
  0x36   :  { %235 = vmatpush.msra.mxu3 %v168_v46 }
  0x37   :  { %254 = vmatpush.msra.mxu0 %v185_v53  ;;  %272 = vmatpush.msra.mxu1 %v203_v57 }
  0x39   :  { %255 = vmatpush.msra.mxu0 %v184_v55  ;;  %273 = vmatpush.msra.mxu1 %v202_v58 }
  0x3b   :  { %274 = vmatpush.msra.mxu1 %v201_v59 }
  0x3d   :  { %275 = vmatpush.msra.mxu1 %v200_v60 }
  0x9f   :  { %v122_v63 = vpop.f32.mrf.mxu2 }
  0xa0   :  { %v123_v0 = vadd.f32 %v122_v63, %v95_v62 }
  0xa2   :  { %v165_v1 = vmax.f32 %v123_v0, 0.0 }
  0xa4   :  { %236 = vmatmul.f32.vlgmr.msra.gmra.mxu3 %v165_v1 }
  0xa7   :  { %v142_v3 = vpop.f32.mrf.mxu2 }
  0xa8   :  { %v143_v4 = vadd.f32 %v142_v3, %v96_v2 }
  0xaa   :  { %v166_v5 = vmax.f32 %v143_v4, 0.0 }
  0xac   :  { %256 = vmatmul.f32.vlgmr.msra.gmra.mxu0 %v166_v5 }
  0xaf   :  { %v162_v7 = vpop.f32.mrf.mxu2 }
  0xb0   :  { %v163_v8 = vadd.f32 %v162_v7, %v97_v6 }
  0xb2   :  { %v167_v9 = vmax.f32 %v163_v8, 0.0 }
  0xb4   :  { %276 = vmatmul.f32.vlgmr.msra.gmra.mxu1 %v167_v9 }
 0x127   :  { %v237_v11 = vpop.f32.mrf.mxu3 }
 0x128   :  { %v238_v12 = vadd.f32 %v312_v10, %v237_v11 }
 0x129   :  { %v257_v13 = vpop.f32.mrf.mxu0 }
 0x12a   :  { %v258_v14 = vadd.f32 %v257_v13, %v238_v12 }
 0x131   :  { %v277_v15 = vpop.f32.mrf.mxu1 }
 0x132   :  { %v278_v16 = vadd.f32 %v277_v15, %v258_v14 }
 0x134   :  { %280 = vst [vmem:[#allocation10] sm:$0xff] %v278_v16 }
 0x135   :  { %291 = dma.vmem_to_hbm [thread:$0]  %s287_s16, 128, %s289_s19, [#allocation4]  }
 0x136   :  { %439 = dma.done.wait [#allocation4], 128  }
 0x137   :  { %440 = vsyncadd [#allocation4], 4294967168 }
 0x138   :  { %296 = vsyncpa [#allocation3], 1 }
 0x139   :  { %297 = vsyncpa [#allocation6], 1 }
 0x13a   :  { %298 = vsyncpa [#allocation9], 1 }
 0x13b   :  { %299 = vsyncpa [#allocation4], 1 }

</bundles_post_ra>
